<compile_context>
chip_gen: v6e
topology: v6e:2x2x1
jax: 0.10.0
libtpu: 0.0.40
codegen_flags: <defaults>
</compile_context>

<pallas_src>
import math

import jax
import jax.numpy as jnp
from jax.experimental import pallas as pl
from jax.experimental.pallas import tpu as pltpu


def _round_up(x: int, m: int) -> int:
    return ((x + m - 1) // m) * m


def _mean_vfe_kernel(feat_ref, npts_ref, summat_ref, expmat_ref, out_ref):
    # feat_ref   : (TILE_R, G*P*C)  packed, lane-dense point features
    # npts_ref   : (TILE_R, G)      valid-point counts (float32)
    # summat_ref : (G*P*C, G*C)     constant 0/1 "sum over the P points" matrix
    # expmat_ref : (G, G*C)         constant 0/1 "repeat each count C times"
    # out_ref    : (TILE_R, G*C)    packed, lane-dense per-voxel means
    x = feat_ref[...]

    # Point-sum on the MXU, accumulating in float32 (keeps VPU/XLU free and
    # avoids bf16 accumulation loss).
    sums = jnp.dot(x, summat_ref[...], preferred_element_type=jnp.float32)

    # clamp_min(counts, 1.0) -> reciprocal -> broadcast each count to its C
    # channel lanes via a tiny constant matmul (no cross-lane shuffles).
    inv = pl.reciprocal(jnp.maximum(npts_ref[...], 1.0), approx=False)
    inv_b = jnp.dot(inv, expmat_ref[...], preferred_element_type=jnp.float32)

    out_ref[...] = (sums * inv_b).astype(out_ref.dtype)


def mean_vfe(voxel_features: jax.Array, voxel_num_points: jax.Array,
             tile_rows: int = 512) -> jax.Array:
    """Pallas implementation of MeanVFE.forward.

    Args:
      voxel_features:   (num_voxels, max_points_per_voxel, C)
      voxel_num_points: (num_voxels,)  int or float counts
      tile_rows:        packed rows (each = G voxels) per grid step; auto-capped.
    Returns:
      (num_voxels, C) per-voxel mean, dtype of voxel_features.
    """
    n, p, c = voxel_features.shape
    dtype = voxel_features.dtype
    itemsize = jnp.dtype(dtype).itemsize

    # ---- choose G (voxels packed per row) -----------------------------------
    # Smallest G with (G*C) % 128 == 0 gives fully lane-dense stores.  If the
    # resulting constant sum-matrix (G*P*C, G*C) would be too big (odd C /
    # large P), halve G until the resident constants fit an 8 MiB cap.
    g = 128 // math.gcd(c, 128)
    const_cap = 8 * 1024 * 1024
    while g > 1 and (g * p * c) * (g * c) * itemsize + g * (g * c) * 4 > const_cap:
        g //= 2
    gpc = g * p * c                    # packed input row width
    gc = g * c                         # packed output row width

    sub = 8 if itemsize >= 4 else 16   # sublane granularity for the block shape
    rows_needed = -(-n // g)

    # ---- choose TILE_R ------------------------------------------------------
    # (a) VMEM budget: double-buffered (input + output + counts) plus the
    #     resident constant matrices must stay <= ~24 MiB (safe for v7x's
    #     64 MiB VMEM / 32 MiB default scoped limit; plenty for v5e/v6e).
    const_bytes = gpc * gc * itemsize + g * gc * 4
    budget = 24 * 1024 * 1024 - 2 * const_bytes
    per_row_bytes = gpc * itemsize + gc * itemsize + g * 4
    max_rows_budget = max(sub, (budget // (2 * per_row_bytes)) // sub * sub)
    tile_rows = min(tile_rows, max_rows_budget)
    # (b) don't tile past the (padded) data for small inputs.
    tile_rows = min(tile_rows, _round_up(rows_needed, sub))
    # (c) when the data is large enough, keep >= ~4 grid steps so both v7x
    #     TensorCores can stream; never shrink below 256 rows (step overhead).
    if rows_needed >= 2 * 256:
        tile_rows = min(tile_rows, max(256, _round_up(-(-rows_needed // 4), sub)))
    tile_rows = max(sub, _round_up(tile_rows, sub))

    rows_pad = _round_up(rows_needed, tile_rows)
    n_pad = rows_pad * g

    # ---- wrapper glue: pads + free contiguous reshapes only -----------------
    if n_pad != n:
        voxel_features = jnp.pad(voxel_features,
                                 ((0, n_pad - n), (0, 0), (0, 0)))
        voxel_num_points = jnp.pad(voxel_num_points, ((0, n_pad - n),))
    feats = voxel_features.reshape(rows_pad, gpc)                 # free reshape
    npts = voxel_num_points.reshape(rows_pad, g).astype(jnp.float32)

    # Constant 0/1 matrices (stay resident in VMEM: index_map is constant).
    i_in = jnp.arange(gpc)
    i_out = jnp.arange(gc)
    summat = ((i_in[:, None] // (p * c) == i_out[None, :] // c)
              & (i_in[:, None] % c == i_out[None, :] % c)).astype(dtype)
    expmat = (jnp.arange(g)[:, None] == (i_out[None, :] // c)).astype(jnp.float32)

    grid = (rows_pad // tile_rows,)
    flops = 2 * rows_pad * gpc * gc + 2 * rows_pad * g * gc
    bytes_accessed = (rows_pad * (gpc + gc) * itemsize
                      + rows_pad * g * 4 + const_bytes)

    out = pl.pallas_call(
        _mean_vfe_kernel,
        out_shape=jax.ShapeDtypeStruct((rows_pad, gc), dtype),
        grid_spec=pltpu.PrefetchScalarGridSpec(
            num_scalar_prefetch=0,
            grid=grid,
            in_specs=[
                pl.BlockSpec((tile_rows, gpc), lambda i: (i, 0)),
                pl.BlockSpec((tile_rows, g), lambda i: (i, 0)),
                pl.BlockSpec((gpc, gc), lambda i: (0, 0)),
                pl.BlockSpec((g, gc), lambda i: (0, 0)),
            ],
            out_specs=pl.BlockSpec((tile_rows, gc), lambda i: (i, 0)),
        ),
        compiler_params=pltpu.CompilerParams(
            dimension_semantics=("parallel",),
            vmem_limit_bytes=32 * 1024 * 1024),
        cost_estimate=pl.CostEstimate(
            flops=int(flops), transcendentals=0,
            bytes_accessed=int(bytes_accessed)),
    )(feats, npts, summat, expmat)

    # Free reshape back to (n_pad, C); drop the padded voxels.
    return out.reshape(n_pad, c)[:n]


def mean_vfe_reference(voxel_features, voxel_num_points):
    points_sum = jnp.sum(voxel_features.astype(jnp.float32), axis=1)
    normalizer = jnp.maximum(
        voxel_num_points.reshape(-1, 1).astype(jnp.float32), 1.0)
    return (points_sum / normalizer).astype(voxel_features.dtype)


if __name__ == "__main__":
    key = jax.random.PRNGKey(0)
    k1, k2, k3, k4 = jax.random.split(key, 4)

    # ---- Test 1: standard MeanVFE config (num_point_features=4) ------------
    n1, p1, c1 = 64, 8, 4
    vf1 = jax.random.normal(k1, (n1, p1, c1), dtype=jnp.float32)
    # counts in [0, max_points]; include zeros to exercise clamp_min(1.0)
    np1 = jax.random.randint(k2, (n1,), 0, p1 + 1, dtype=jnp.int32)

    out1 = jax.block_until_ready(mean_vfe(vf1, np1))
    ref1 = mean_vfe_reference(vf1, np1)
    assert out1.shape == (n1, c1)
    assert jnp.allclose(out1, ref1, atol=1e-5, rtol=1e-5), "mismatch (C=4)"

    # ---- Test 2: awkward channel count (C=5) exercises the capped-G path ---
    n2, p2, c2 = 60, 16, 5
    vf2 = jax.random.normal(k3, (n2, p2, c2), dtype=jnp.float32)
    np2 = jax.random.randint(k4, (n2,), 0, p2 + 1, dtype=jnp.int32)

    out2 = jax.block_until_ready(mean_vfe(vf2, np2))
    ref2 = mean_vfe_reference(vf2, np2)
    assert out2.shape == (n2, c2)
    assert jnp.allclose(out2, ref2, atol=1e-5, rtol=1e-5), "mismatch (C=5)"

    print("KERNEL_OK")
</pallas_src>

<mosaic_0001>
module attributes {stable_mosaic.version = 11 : i64} {
  func.func @_mean_vfe_kernel(%arg0: i32, %arg1: memref<8x1024xf32, #tpu.memory_space<vmem>>, %arg2: memref<8x32xf32, #tpu.memory_space<vmem>>, %arg3: memref<1024x128xf32, #tpu.memory_space<vmem>>, %arg4: memref<32x128xf32, #tpu.memory_space<vmem>>, %arg5: memref<8x128xf32, #tpu.memory_space<vmem>>) attributes {dimension_semantics = [#tpu.dimension_semantics<parallel>], iteration_bounds = array<i64: 1>, scalar_prefetch = 0 : i64, scratch_operands = 0 : i64, tpu.core_type = #tpu.core_type<tc>, window_params = [{transform_indices = @transform_0, window_bounds = array<i64: 8, 1024>}, {transform_indices = @transform_1, window_bounds = array<i64: 8, 32>}, {pipeline_mode = #tpu.pipeline_mode<synchronous>, transform_indices = @transform_2, window_bounds = array<i64: 1024, 128>}, {pipeline_mode = #tpu.pipeline_mode<synchronous>, transform_indices = @transform_3, window_bounds = array<i64: 32, 128>}, {transform_indices = @transform_4, window_bounds = array<i64: 8, 128>}]} {
    %c0 = arith.constant 0 : index
    %c0_0 = arith.constant 0 : index
    %0 = vector.load %arg1[%c0, %c0_0] : memref<8x1024xf32, #tpu.memory_space<vmem>>, vector<8x1024xf32>
    %c0_1 = arith.constant 0 : index
    %c0_2 = arith.constant 0 : index
    %1 = vector.load %arg3[%c0_1, %c0_2] : memref<1024x128xf32, #tpu.memory_space<vmem>>, vector<1024x128xf32>
    %cst = arith.constant dense<0.000000e+00> : vector<8x128xf32>
    %2 = tpu.matmul %0, %1, %cst {dimension_numbers = #tpu.dot_dimension_numbers<[1], [0], [0], [1], [0, 0, 1, 1], [], []>} : vector<8x1024xf32>, vector<1024x128xf32>, vector<8x128xf32> -> vector<8x128xf32>
    %c0_3 = arith.constant 0 : index
    %c0_4 = arith.constant 0 : index
    %3 = vector.load %arg2[%c0_3, %c0_4] : memref<8x32xf32, #tpu.memory_space<vmem>>, vector<8x32xf32>
    %cst_5 = arith.constant 1.000000e+00 : f32
    %4 = vector.broadcast %cst_5 : f32 to vector<8x32xf32>
    %5 = arith.maximumf %3, %4 : vector<8x32xf32>
    %6 = tpu.reciprocal %5 : vector<8x32xf32> -> vector<8x32xf32>
    %c0_6 = arith.constant 0 : index
    %c0_7 = arith.constant 0 : index
    %7 = vector.load %arg4[%c0_6, %c0_7] : memref<32x128xf32, #tpu.memory_space<vmem>>, vector<32x128xf32>
    %cst_8 = arith.constant dense<0.000000e+00> : vector<8x128xf32>
    %8 = tpu.matmul %6, %7, %cst_8 {dimension_numbers = #tpu.dot_dimension_numbers<[1], [0], [0], [1], [0, 0, 1, 1], [], []>} : vector<8x32xf32>, vector<32x128xf32>, vector<8x128xf32> -> vector<8x128xf32>
    %9 = arith.mulf %2, %8 : vector<8x128xf32>
    %c0_9 = arith.constant 0 : index
    %c0_10 = arith.constant 0 : index
    %10 = vector.load %arg5[%c0_9, %c0_10] : memref<8x128xf32, #tpu.memory_space<vmem>>, vector<8x128xf32>
    tpu.vector_store %arg5[%c0_9, %c0_10], %9 {strides = array<i32>} : memref<8x128xf32, #tpu.memory_space<vmem>>, vector<8x128xf32>,
    return
  }
  func.func @transform_0(%arg0: i32) -> (i32, i32) {
    %c0_i32 = arith.constant 0 : i32
    %c0_i32_0 = arith.constant 0 : i32
    return %arg0, %c0_i32 : i32, i32
  }
  func.func @transform_1(%arg0: i32) -> (i32, i32) {
    %c0_i32 = arith.constant 0 : i32
    %c0_i32_0 = arith.constant 0 : i32
    return %arg0, %c0_i32 : i32, i32
  }
  func.func @transform_2(%arg0: i32) -> (i32, i32) {
    %c0_i32 = arith.constant 0 : i32
    %c0_i32_0 = arith.constant 0 : i32
    %c0_i32_1 = arith.constant 0 : i32
    return %c0_i32, %c0_i32_0 : i32, i32
  }
  func.func @transform_3(%arg0: i32) -> (i32, i32) {
    %c0_i32 = arith.constant 0 : i32
    %c0_i32_0 = arith.constant 0 : i32
    %c0_i32_1 = arith.constant 0 : i32
    return %c0_i32, %c0_i32_0 : i32, i32
  }
  func.func @transform_4(%arg0: i32) -> (i32, i32) {
    %c0_i32 = arith.constant 0 : i32
    %c0_i32_0 = arith.constant 0 : i32
    return %arg0, %c0_i32 : i32, i32
  }
}

</mosaic_0001>

<bundles_post_ra>
// kernel: tpu_custom_call.1
= control target key start
LH: loop header
LB: loop body
LE: loop exit
PB: predicated region body
PF: predicated region fallthrough
CT: control target
= control target key end

     0   :  { %9 = vsyncpa [#allocation3], 0  ;;  %s910_s0 = inlined_call_operand.hbm [shape: f32[8,1024], index: 0, kind: input, shape index: {}]   ;;  %s911_s1 = inlined_call_operand.hbm [shape: f32[8,32], index: 1, kind: input, shape index: {}]   ;;  %s912_s2 = inlined_call_operand.hbm [shape: f32[1024,128], index: 2, kind: input, shape index: {}]   ;;  %s913_s3 = inlined_call_operand.hbm [shape: f32[32,128], index: 3, kind: input, shape index: {}]   ;;  %s914_s4 = inlined_call_operand.hbm [shape: f32[8,128], index: 4, kind: output, shape index: {}]  }
   0x1   :  { %10 = vsyncpa [#allocation6], 0 }
   0x2   :  { %11 = vsyncpa [#allocation9], 0 }
   0x3   :  { %12 = vsyncpa [#allocation4], 0  ;;  %s861_s15 = smov [#allocation5]   ;;  %s862_s17 = smov [#allocation2]  }
   0x4   :  { %s29_s16 = sshll.u32 %s861_s15, 4  ;;  %s19_s18 = sshll.u32 %s862_s17, 4  ;;  %s30_s16 = int_to_ptr.vmem [resolvable:$true] %s29_s16  ;;  %s20_s18 = int_to_ptr.vmem [resolvable:$true] %s19_s18 }
   0x5   :  { %s761_s19 = scalar_lea.vmem %s30_s16, 128  ;;  %p766_p1 = scmp.lt.s32.totalorder %s30_s16, %s30_s16 }
   0x6   :  { %p762_p0 = scmp.ne.s32.totalorder %s30_s16, %s761_s19  ;;  %p767_p2 = scmp.lt.s32.totalorder %s761_s19, %s761_s19 }
   0x8   :  { %p768_p3 = por %p767_p2, %p766_p1 }
   0xa   :  { %p769_p4 = pnand %p768_p3, %p762_p0 }
   0xc   :  { %772 = shalt.err (!%p769_p4)
}
   0xd   :  { %32 = dma.hbm_to_vmem [thread:$0]  %s911_s1, 128, %s30_s16, [#allocation6]  }
   0xe   :  { %s781_s22 = scalar_lea.vmem %s20_s18, 1024  ;;  %p786_p6 = scmp.lt.s32.totalorder %s20_s18, %s20_s18 }
   0xf   :  { %p782_p5 = scmp.ne.s32.totalorder %s20_s18, %s781_s22  ;;  %p787_p7 = scmp.lt.s32.totalorder %s781_s22, %s781_s22 }
  0x11   :  { %p788_p8 = por %p787_p7, %p786_p6 }
  0x13   :  { %p789_p9 = pnand %p788_p8, %p782_p5 }
  0x15   :  { %792 = shalt.err (!%p789_p9)
}
  0x16   :  { %22 = dma.hbm_to_vmem [thread:$0]  %s910_s0, 1024, %s20_s18, [#allocation3]  }
  0x17   :  { %s863_s25 = smov [#allocation7]  }
  0x18   :  { %s38_s26 = sshll.u32 %s863_s25, 4  ;;  %s39_s26 = int_to_ptr.vmem [resolvable:$true] %s38_s26 }
  0x19   :  { %s801_s27 = scalar_lea.vmem %s39_s26, 16384  ;;  %p806_p11 = scmp.lt.s32.totalorder %s39_s26, %s39_s26 }
  0x1a   :  { %p802_p10 = scmp.ne.s32.totalorder %s39_s26, %s801_s27  ;;  %p807_p12 = scmp.lt.s32.totalorder %s801_s27, %s801_s27 }
  0x1c   :  { %p808_p13 = por %p807_p12, %p806_p11 }
  0x1e   :  { %p809_p0 = pnand %p808_p13, %p802_p10 }
  0x20   :  { %812 = shalt.err (!%p809_p0)
}
  0x21   :  { %s864_s1 = smov 128   ;;  %s865_s28 = smov 8  }
  0x22   :  { %44 = dma.hbm_to_vmem [thread:$0]  %s912_s2, 16384, %s39_s26, [#allocation6], %s864_s1, %s864_s1, %s865_s28  }
  0x23   :  { %s866_s5 = smov [#allocation8]  }
  0x24   :  { %s50_s6 = sshll.u32 %s866_s5, 4  ;;  %s51_s6 = int_to_ptr.vmem [resolvable:$true] %s50_s6 }
  0x25   :  { %s821_s0 = scalar_lea.vmem %s51_s6, 512  ;;  %p826_p2 = scmp.lt.s32.totalorder %s51_s6, %s51_s6 }
  0x26   :  { %p822_p1 = scmp.ne.s32.totalorder %s51_s6, %s821_s0  ;;  %p827_p3 = scmp.lt.s32.totalorder %s821_s0, %s821_s0 }
  0x28   :  { %p828_p4 = por %p827_p3, %p826_p2 }
  0x2a   :  { %p829_p5 = pnand %p828_p4, %p822_p1 }
  0x2c   :  { %832 = shalt.err (!%p829_p5)
}
  0x2d   :  { %56 = dma.hbm_to_vmem [thread:$0]  %s913_s3, 512, %s51_s6, [#allocation9], %s864_s1, %s864_s1, %s865_s28  }
  0x2e   :  { %853 = dma.done.wait [#allocation3], 1024  }
  0x2f   :  { %854 = vsyncadd [#allocation3], 4294966272 }
  0x30   :  { %855 = dma.done.wait [#allocation6], 16512  }
  0x31   :  { %856 = vsyncadd [#allocation6], 4294950784 }
  0x32   :  { %857 = dma.done.wait [#allocation9], 512  }
  0x33   :  { %858 = vsyncadd [#allocation9], 4294966784  ;;  %v108_v0 = vld [vmem:[#allocation7 + $0xf8] sm:$0xff]  ;;  %v107_v4 = vld [vmem:[#allocation7 + $0xf0] sm:$0xff]  ;;  %vm868_vm0 = vmmov 0   ;;  %vm492_vm1 = vcmask 261120  }
  0x34   :  { %v140_v1 = vld [vmem:[#allocation7 + $0x1f8] sm:$0xff]  ;;  %586 = vmatprep.subr.mxu0 %v108_v0  ;;  %v139_v5 = vld [vmem:[#allocation7 + $0x1f0] sm:$0xff]  ;;  %v106_v8 = vld [vmem:[#allocation7 + $0xe8] sm:$0xff]  ;;  %s869_s2 = smov [#allocation10]  }
  0x35   :  { %v92_v2 = vld [vmem:[#allocation7 + $0x78] sm:$0xff]  ;;  %621 = vmatprep.subr.mxu1 %v140_v1  ;;  %v91_v6 = vld [vmem:[#allocation7 + $0x70] sm:$0xff]  ;;  %v138_v9 = vld [vmem:[#allocation7 + $0x1e8] sm:$0xff]  ;;  %s574_s3 = sshll.u32 %s869_s2, 4  ;;  %s575_s3 = int_to_ptr.vmem [resolvable:$true] %s574_s3 }
  0x36   :  { %v124_v3 = vld [vmem:[#allocation7 + $0x178] sm:$0xff]  ;;  %587 = vmatpush3.msra.mxu0 %v92_v2  ;;  %v123_v7 = vld [vmem:[#allocation7 + $0x170] sm:$0xff]  ;;  %v90_v10 = vld [vmem:[#allocation7 + $0x68] sm:$0xff]  ;;  %s833_s9 = scalar_lea.vmem %s575_s3, 128  ;;  %p838_p7 = scmp.lt.s32.totalorder %s575_s3, %s575_s3 }
  0x37   :  { %622 = vmatpush3.msra.mxu1 %v124_v3  ;;  %588 = vmatprep.subr.mxu0 %v107_v4  ;;  %v122_v11 = vld [vmem:[#allocation7 + $0x168] sm:$0xff]  ;;  %v105_v12 = vld [vmem:[#allocation7 + $0xe0] sm:$0xff]  ;;  %v104_v16 = vld [vmem:[#allocation7 + $0xd8] sm:$0xff]  ;;  %p834_p6 = scmp.ne.s32.totalorder %s575_s3, %s833_s9  ;;  %p839_p8 = scmp.lt.s32.totalorder %s833_s9, %s833_s9 }
  0x38   :  { %623 = vmatprep.subr.mxu1 %v139_v5  ;;  %589 = vmatpush3.msra.mxu0 %v91_v6  ;;  %v137_v13 = vld [vmem:[#allocation7 + $0x1e0] sm:$0xff]  ;;  %v136_v17 = vld [vmem:[#allocation7 + $0x1d8] sm:$0xff]  ;;  %v103_v20 = vld [vmem:[#allocation7 + $0xd0] sm:$0xff] }
  0x39   :  { %624 = vmatpush3.msra.mxu1 %v123_v7  ;;  %590 = vmatprep.subr.mxu0 %v106_v8  ;;  %v89_v14 = vld [vmem:[#allocation7 + $0x60] sm:$0xff]  ;;  %v88_v18 = vld [vmem:[#allocation7 + $0x58] sm:$0xff]  ;;  %v135_v21 = vld [vmem:[#allocation7 + $0x1d0] sm:$0xff]  ;;  %p840_p9 = por %p839_p8, %p838_p7 }
  0x3a   :  { %625 = vmatprep.subr.mxu1 %v138_v9  ;;  %v121_v15 = vld [vmem:[#allocation7 + $0x160] sm:$0xff]  ;;  %591 = vmatpush3.msra.mxu0 %v90_v10  ;;  %v120_v19 = vld [vmem:[#allocation7 + $0x158] sm:$0xff]  ;;  %v87_v22 = vld [vmem:[#allocation7 + $0x50] sm:$0xff] }
  0x3b   :  { %626 = vmatpush3.msra.mxu1 %v122_v11  ;;  %592 = vmatprep.subr.mxu0 %v105_v12  ;;  %v119_v23 = vld [vmem:[#allocation7 + $0x150] sm:$0xff]  ;;  %v102_v24 = vld [vmem:[#allocation7 + $0xc8] sm:$0xff]  ;;  %v101_v28 = vld [vmem:[#allocation7 + $0xc0] sm:$0xff]  ;;  %p841_p10 = pnand %p840_p9, %p834_p6 }
  0x3c   :  { %627 = vmatprep.subr.mxu1 %v137_v13  ;;  %593 = vmatpush3.msra.mxu0 %v89_v14  ;;  %v134_v25 = vld [vmem:[#allocation7 + $0x1c8] sm:$0xff]  ;;  %v133_v29 = vld [vmem:[#allocation7 + $0x1c0] sm:$0xff]  ;;  %v100_v32 = vld [vmem:[#allocation7 + $0xb8] sm:$0xff] }
  0x3d   :  { %628 = vmatpush3.msra.mxu1 %v121_v15  ;;  %594 = vmatprep.subr.mxu0 %v104_v16  ;;  %v86_v26 = vld [vmem:[#allocation7 + $0x48] sm:$0xff]  ;;  %v85_v30 = vld [vmem:[#allocation7 + $0x40] sm:$0xff]  ;;  %v132_v33 = vld [vmem:[#allocation7 + $0x1b8] sm:$0xff] }
  0x3e   :  { %629 = vmatprep.subr.mxu1 %v136_v17  ;;  %595 = vmatpush3.msra.mxu0 %v88_v18  ;;  %v118_v27 = vld [vmem:[#allocation7 + $0x148] sm:$0xff]  ;;  %v117_v31 = vld [vmem:[#allocation7 + $0x140] sm:$0xff]  ;;  %v84_v34 = vld [vmem:[#allocation7 + $0x38] sm:$0xff] }
  0x3f   :  { %630 = vmatpush3.msra.mxu1 %v120_v19  ;;  %596 = vmatprep.subr.mxu0 %v103_v20  ;;  %v116_v35 = vld [vmem:[#allocation7 + $0x138] sm:$0xff]  ;;  %v99_v36 = vld [vmem:[#allocation7 + $0xb0] sm:$0xff]  ;;  %v98_v40 = vld [vmem:[#allocation7 + $0xa8] sm:$0xff] }
  0x40   :  { %631 = vmatprep.subr.mxu1 %v135_v21  ;;  %597 = vmatpush3.msra.mxu0 %v87_v22  ;;  %v131_v37 = vld [vmem:[#allocation7 + $0x1b0] sm:$0xff]  ;;  %v130_v41 = vld [vmem:[#allocation7 + $0x1a8] sm:$0xff]  ;;  %v97_v44 = vld [vmem:[#allocation7 + $0xa0] sm:$0xff] }
  0x41   :  { %632 = vmatpush3.msra.mxu1 %v119_v23  ;;  %598 = vmatprep.subr.mxu0 %v102_v24  ;;  %v83_v38 = vld [vmem:[#allocation7 + $0x30] sm:$0xff]  ;;  %v82_v42 = vld [vmem:[#allocation7 + $0x28] sm:$0xff]  ;;  %v129_v45 = vld [vmem:[#allocation7 + $0x1a0] sm:$0xff] }
  0x42   :  { %633 = vmatprep.subr.mxu1 %v134_v25  ;;  %599 = vmatpush3.msra.mxu0 %v86_v26  ;;  %v115_v39 = vld [vmem:[#allocation7 + $0x130] sm:$0xff]  ;;  %v114_v43 = vld [vmem:[#allocation7 + $0x128] sm:$0xff]  ;;  %v81_v46 = vld [vmem:[#allocation7 + $0x20] sm:$0xff] }
  0x43   :  { %634 = vmatpush3.msra.mxu1 %v118_v27  ;;  %600 = vmatprep.subr.mxu0 %v101_v28  ;;  %v113_v47 = vld [vmem:[#allocation7 + $0x120] sm:$0xff]  ;;  %v96_v48 = vld [vmem:[#allocation7 + $0x98] sm:$0xff]  ;;  %v95_v52 = vld [vmem:[#allocation7 + $0x90] sm:$0xff] }
  0x44   :  { %635 = vmatprep.subr.mxu1 %v133_v29  ;;  %601 = vmatpush3.msra.mxu0 %v85_v30  ;;  %v128_v49 = vld [vmem:[#allocation7 + $0x198] sm:$0xff]  ;;  %v127_v53 = vld [vmem:[#allocation7 + $0x190] sm:$0xff]  ;;  %v94_v56 = vld [vmem:[#allocation7 + $0x88] sm:$0xff] }
  0x45   :  { %636 = vmatpush3.msra.mxu1 %v117_v31  ;;  %602 = vmatprep.subr.mxu0 %v100_v32  ;;  %v80_v50 = vld [vmem:[#allocation7 + $0x18] sm:$0xff]  ;;  %v79_v54 = vld [vmem:[#allocation7 + $0x10] sm:$0xff]  ;;  %v126_v57 = vld [vmem:[#allocation7 + $0x188] sm:$0xff] }
  0x46   :  { %637 = vmatprep.subr.mxu1 %v132_v33  ;;  %603 = vmatpush3.msra.mxu0 %v84_v34  ;;  %v112_v51 = vld [vmem:[#allocation7 + $0x118] sm:$0xff]  ;;  %v111_v55 = vld [vmem:[#allocation7 + $0x110] sm:$0xff]  ;;  %v78_v58 = vld [vmem:[#allocation7 + $0x8] sm:$0xff] }
  0x47   :  { %638 = vmatpush3.msra.mxu1 %v116_v35  ;;  %604 = vmatprep.subr.mxu0 %v99_v36  ;;  %v110_v59 = vld [vmem:[#allocation7 + $0x108] sm:$0xff]  ;;  %v93_v60 = vld [vmem:[#allocation7 + $0x80] sm:$0xff]  ;;  %v72_v1 = vld [vmem:[#allocation2 + $0x18] sm:$0xff] }
  0x48   :  { %639 = vmatprep.subr.mxu1 %v131_v37  ;;  %605 = vmatpush3.msra.mxu0 %v83_v38  ;;  %v125_v61 = vld [vmem:[#allocation7 + $0x180] sm:$0xff]  ;;  %v69_v2 = vld [vmem:[#allocation2] sm:$0xff]  ;;  %v71_v3 = vld [vmem:[#allocation2 + $0x10] sm:$0xff] }
  0x49   :  { %640 = vmatpush3.msra.mxu1 %v115_v39  ;;  %606 = vmatprep.subr.mxu0 %v98_v40  ;;  %v77_v62 = vld [vmem:[#allocation7] sm:$0xff]  ;;  %v172_v4 = vld [vmem:[#allocation7 + $0x2f8] sm:$0xff]  ;;  %v171_v8 = vld [vmem:[#allocation7 + $0x2f0] sm:$0xff] }
  0x4a   :  { %641 = vmatprep.subr.mxu1 %v130_v41  ;;  %607 = vmatpush3.msra.mxu0 %v82_v42  ;;  %v70_v63 = vld [vmem:[#allocation2 + $0x8] sm:$0xff]  ;;  %v204_v5 = vld [vmem:[#allocation7 + $0x3f8] sm:$0xff]  ;;  %v203_v9 = vld [vmem:[#allocation7 + $0x3f0] sm:$0xff] }
  0x4b   :  { %642 = vmatpush3.msra.mxu1 %v114_v43  ;;  %608 = vmatprep.subr.mxu0 %v97_v44  ;;  %v109_v0 = vld [vmem:[#allocation7 + $0x100] sm:$0xff]  ;;  %v156_v6 = vld [vmem:[#allocation7 + $0x278] sm:$0xff]  ;;  %v155_v10 = vld [vmem:[#allocation7 + $0x270] sm:$0xff] }
  0x4c   :  { %643 = vmatprep.subr.mxu1 %v129_v45  ;;  %609 = vmatpush3.msra.mxu0 %v81_v46  ;;  %v188_v7 = vld [vmem:[#allocation7 + $0x378] sm:$0xff]  ;;  %v187_v11 = vld [vmem:[#allocation7 + $0x370] sm:$0xff]  ;;  %v170_v12 = vld [vmem:[#allocation7 + $0x2e8] sm:$0xff] }
  0x4d   :  { %644 = vmatpush3.msra.mxu1 %v113_v47  ;;  %610 = vmatprep.subr.mxu0 %v96_v48  ;;  %v202_v13 = vld [vmem:[#allocation7 + $0x3e8] sm:$0xff]  ;;  %v169_v16 = vld [vmem:[#allocation7 + $0x2e0] sm:$0xff]  ;;  %v168_v20 = vld [vmem:[#allocation7 + $0x2d8] sm:$0xff] }
  0x4e   :  { %645 = vmatprep.subr.mxu1 %v128_v49  ;;  %611 = vmatpush3.msra.mxu0 %v80_v50  ;;  %v154_v14 = vld [vmem:[#allocation7 + $0x268] sm:$0xff]  ;;  %v201_v17 = vld [vmem:[#allocation7 + $0x3e0] sm:$0xff]  ;;  %v200_v21 = vld [vmem:[#allocation7 + $0x3d8] sm:$0xff] }
  0x4f   :  { %646 = vmatpush3.msra.mxu1 %v112_v51  ;;  %612 = vmatprep.subr.mxu0 %v95_v52  ;;  %v186_v15 = vld [vmem:[#allocation7 + $0x368] sm:$0xff]  ;;  %v153_v18 = vld [vmem:[#allocation7 + $0x260] sm:$0xff]  ;;  %v152_v22 = vld [vmem:[#allocation7 + $0x258] sm:$0xff] }
  0x50   :  { %647 = vmatprep.subr.mxu1 %v127_v53  ;;  %613 = vmatpush3.msra.mxu0 %v79_v54  ;;  %v185_v19 = vld [vmem:[#allocation7 + $0x360] sm:$0xff]  ;;  %v184_v23 = vld [vmem:[#allocation7 + $0x358] sm:$0xff]  ;;  %v167_v24 = vld [vmem:[#allocation7 + $0x2d0] sm:$0xff] }
  0x51   :  { %648 = vmatpush3.msra.mxu1 %v111_v55  ;;  %614 = vmatprep.subr.mxu0 %v94_v56  ;;  %v199_v25 = vld [vmem:[#allocation7 + $0x3d0] sm:$0xff]  ;;  %v166_v28 = vld [vmem:[#allocation7 + $0x2c8] sm:$0xff]  ;;  %v165_v32 = vld [vmem:[#allocation7 + $0x2c0] sm:$0xff] }
  0x52   :  { %649 = vmatprep.subr.mxu1 %v126_v57  ;;  %615 = vmatpush3.msra.mxu0 %v78_v58  ;;  %v151_v26 = vld [vmem:[#allocation7 + $0x250] sm:$0xff]  ;;  %v198_v29 = vld [vmem:[#allocation7 + $0x3c8] sm:$0xff]  ;;  %v197_v33 = vld [vmem:[#allocation7 + $0x3c0] sm:$0xff] }
  0x53   :  { %650 = vmatpush3.msra.mxu1 %v110_v59  ;;  %616 = vmatprep.subr.mxu0 %v93_v60  ;;  %v183_v27 = vld [vmem:[#allocation7 + $0x350] sm:$0xff]  ;;  %v150_v30 = vld [vmem:[#allocation7 + $0x248] sm:$0xff]  ;;  %v149_v34 = vld [vmem:[#allocation7 + $0x240] sm:$0xff] }
  0x54   :  { %651 = vmatprep.subr.mxu1 %v125_v61  ;;  %617 = vmatpush3.msra.mxu0 %v77_v62  ;;  %v182_v31 = vld [vmem:[#allocation7 + $0x348] sm:$0xff]  ;;  %v181_v35 = vld [vmem:[#allocation7 + $0x340] sm:$0xff]  ;;  %v164_v36 = vld [vmem:[#allocation7 + $0x2b8] sm:$0xff] }
  0x55   :  { %269 = vmatprep.mubr.f32.mxu0 %v70_v63  ;;  %652 = vmatpush3.msra.mxu1 %v109_v0  ;;  %v196_v37 = vld [vmem:[#allocation7 + $0x3b8] sm:$0xff]  ;;  %v163_v40 = vld [vmem:[#allocation7 + $0x2b0] sm:$0xff]  ;;  %v162_v44 = vld [vmem:[#allocation7 + $0x2a8] sm:$0xff] }
  0x56   :  { %339 = vmatprep.mubr.f32.mxu1 %v72_v1  ;;  %270 = vmatmul.mubr.f32.vlgmr.msra.gmra.mxu0 %v69_v2  ;;  %v148_v38 = vld [vmem:[#allocation7 + $0x238] sm:$0xff]  ;;  %v195_v41 = vld [vmem:[#allocation7 + $0x3b0] sm:$0xff]  ;;  %v194_v45 = vld [vmem:[#allocation7 + $0x3a8] sm:$0xff] }
  0x57   :  { %340 = vmatmul.mubr.f32.vlgmr.msra.gmra.mxu1 %v71_v3  ;;  %656 = vmatprep.subr.mxu0 %v172_v4  ;;  %v180_v39 = vld [vmem:[#allocation7 + $0x338] sm:$0xff]  ;;  %v147_v42 = vld [vmem:[#allocation7 + $0x230] sm:$0xff]  ;;  %v146_v46 = vld [vmem:[#allocation7 + $0x228] sm:$0xff] }
  0x58   :  { %691 = vmatprep.subr.mxu1 %v204_v5  ;;  %657 = vmatpush3.msra.mxu0 %v156_v6  ;;  %v179_v43 = vld [vmem:[#allocation7 + $0x330] sm:$0xff]  ;;  %v178_v47 = vld [vmem:[#allocation7 + $0x328] sm:$0xff]  ;;  %v161_v48 = vld [vmem:[#allocation7 + $0x2a0] sm:$0xff] }
  0x59   :  { %692 = vmatpush3.msra.mxu1 %v188_v7  ;;  %658 = vmatprep.subr.mxu0 %v171_v8  ;;  %v193_v49 = vld [vmem:[#allocation7 + $0x3a0] sm:$0xff]  ;;  %v485_v50 = vld [vmem:[#allocation5] sm:$0xff]  ;;  %v159_v58 = vld [vmem:[#allocation7 + $0x290] sm:$0xff] }
  0x5a   :  { %693 = vmatprep.subr.mxu1 %v203_v9  ;;  %659 = vmatpush3.msra.mxu0 %v155_v10  ;;  %v145_v51 = vld [vmem:[#allocation7 + $0x220] sm:$0xff]  ;;  %v160_v53 = vld [vmem:[#allocation7 + $0x298] sm:$0xff]  ;;  %v486_v57 = vmax.f32 %v485_v50, 1.0  ;;  %v191_v59 = vld [vmem:[#allocation7 + $0x390] sm:$0xff] }
  0x5b   :  { %694 = vmatpush3.msra.mxu1 %v187_v11  ;;  %660 = vmatprep.subr.mxu0 %v170_v12  ;;  %v177_v52 = vld [vmem:[#allocation7 + $0x320] sm:$0xff]  ;;  %v192_v54 = vld [vmem:[#allocation7 + $0x398] sm:$0xff]  ;;  %v143_v60 = vld [vmem:[#allocation7 + $0x210] sm:$0xff]  ;;  %v867_v11 = vmov 0.0  }
  0x5c   :  { %695 = vmatprep.subr.mxu1 %v202_v13  ;;  %661 = vmatpush3.msra.mxu0 %v154_v14  ;;  %v144_v55 = vld [vmem:[#allocation7 + $0x218] sm:$0xff]  ;;  %v175_v61 = vld [vmem:[#allocation7 + $0x310] sm:$0xff]  ;;  %v158_v62 = vld [vmem:[#allocation7 + $0x288] sm:$0xff]  ;;  %751 = vrcp.f32 %v486_v57 }
  0x5d   :  { %696 = vmatpush3.msra.mxu1 %v186_v15  ;;  %662 = vmatprep.subr.mxu0 %v169_v16  ;;  %v176_v56 = vld [vmem:[#allocation7 + $0x318] sm:$0xff]  ;;  %v190_v63 = vld [vmem:[#allocation7 + $0x388] sm:$0xff]  ;;  %v157_v2 = vld [vmem:[#allocation7 + $0x280] sm:$0xff] }
  0x5e   :  { %697 = vmatprep.subr.mxu1 %v201_v17  ;;  %663 = vmatpush3.msra.mxu0 %v153_v18  ;;  %v142_v0 = vld [vmem:[#allocation7 + $0x208] sm:$0xff]  ;;  %v189_v3 = vld [vmem:[#allocation7 + $0x380] sm:$0xff]  ;;  %v76_v7 = vld [vmem:[#allocation2 + $0x38] sm:$0xff] }
  0x5f   :  { %698 = vmatpush3.msra.mxu1 %v185_v19  ;;  %664 = vmatprep.subr.mxu0 %v168_v20  ;;  %v174_v1 = vld [vmem:[#allocation7 + $0x308] sm:$0xff]  ;;  %v141_v4 = vld [vmem:[#allocation7 + $0x200] sm:$0xff]  ;;  %v73_v8 = vld [vmem:[#allocation2 + $0x20] sm:$0xff] }
  0x60   :  { %699 = vmatprep.subr.mxu1 %v200_v21  ;;  %665 = vmatpush3.msra.mxu0 %v152_v22  ;;  %v74_v5 = vld [vmem:[#allocation2 + $0x28] sm:$0xff]  ;;  %v75_v9 = vld [vmem:[#allocation2 + $0x30] sm:$0xff]  ;;  %v491_v10 = vld [vmem:[#allocation8 + $0x18] sm:$0xff] }
  0x61   :  { %700 = vmatpush3.msra.mxu1 %v184_v23  ;;  %666 = vmatprep.subr.mxu0 %v167_v24  ;;  %v173_v6 = vld [vmem:[#allocation7 + $0x300] sm:$0xff]  ;;  %v490_v12 = vld [vmem:[#allocation8 + $0x10] sm:$0xff]  ;;  %v489_v13 = vld [vmem:[#allocation8 + $0x8] sm:$0xff] }
  0x62   :  { %701 = vmatprep.subr.mxu1 %v199_v25  ;;  %667 = vmatpush3.msra.mxu0 %v151_v26  ;;  %v488_v14 = vld [vmem:[#allocation8] sm:$0xff] }
  0x63   :  { %702 = vmatpush3.msra.mxu1 %v183_v27  ;;  %668 = vmatprep.subr.mxu0 %v166_v28 }
  0x64   :  { %703 = vmatprep.subr.mxu1 %v198_v29  ;;  %669 = vmatpush3.msra.mxu0 %v150_v30 }
  0x65   :  { %704 = vmatpush3.msra.mxu1 %v182_v31  ;;  %670 = vmatprep.subr.mxu0 %v165_v32 }
  0x66   :  { %705 = vmatprep.subr.mxu1 %v197_v33  ;;  %671 = vmatpush3.msra.mxu0 %v149_v34 }
  0x67   :  { %706 = vmatpush3.msra.mxu1 %v181_v35  ;;  %672 = vmatprep.subr.mxu0 %v164_v36 }
  0x68   :  { %707 = vmatprep.subr.mxu1 %v196_v37  ;;  %673 = vmatpush3.msra.mxu0 %v148_v38 }
  0x69   :  { %708 = vmatpush3.msra.mxu1 %v180_v39  ;;  %674 = vmatprep.subr.mxu0 %v163_v40  ;;  %v752_v15 = vpop.eup %751 }
  0x6a   :  { %709 = vmatprep.subr.mxu1 %v195_v41  ;;  %675 = vmatpush3.msra.mxu0 %v147_v42 }
  0x6b   :  { %710 = vmatpush3.msra.mxu1 %v179_v43  ;;  %676 = vmatprep.subr.mxu0 %v162_v44 }
  0x6c   :  { %711 = vmatprep.subr.mxu1 %v194_v45  ;;  %677 = vmatpush3.msra.mxu0 %v146_v46 }
  0x6d   :  { %712 = vmatpush3.msra.mxu1 %v178_v47  ;;  %678 = vmatprep.subr.mxu0 %v161_v48 }
  0x6e   :  { %713 = vmatprep.subr.mxu1 %v193_v49  ;;  %679 = vmatpush3.msra.mxu0 %v145_v51 }
  0x6f   :  { %714 = vmatpush3.msra.mxu1 %v177_v52  ;;  %680 = vmatprep.subr.mxu0 %v160_v53 }
  0x70   :  { %715 = vmatprep.subr.mxu1 %v192_v54  ;;  %681 = vmatpush3.msra.mxu0 %v144_v55 }
  0x71   :  { %716 = vmatpush3.msra.mxu1 %v176_v56  ;;  %682 = vmatprep.subr.mxu0 %v159_v58 }
  0x72   :  { %717 = vmatprep.subr.mxu1 %v191_v59  ;;  %683 = vmatpush3.msra.mxu0 %v143_v60 }
  0x73   :  { %718 = vmatpush3.msra.mxu1 %v175_v61  ;;  %684 = vmatprep.subr.mxu0 %v158_v62 }
  0x74   :  { %719 = vmatprep.subr.mxu1 %v190_v63  ;;  %685 = vmatpush3.msra.mxu0 %v142_v0 }
  0x75   :  { %720 = vmatpush3.msra.mxu1 %v174_v1  ;;  %686 = vmatprep.subr.mxu0 %v157_v2 }
  0x76   :  { %721 = vmatprep.subr.mxu1 %v189_v3  ;;  %687 = vmatpush3.msra.mxu0 %v141_v4 }
  0x77   :  { %409 = vmatprep.mubr.f32.mxu0 %v74_v5  ;;  %722 = vmatpush3.msra.mxu1 %v173_v6 }
  0x78   :  { %479 = vmatprep.mubr.f32.mxu1 %v76_v7  ;;  %410 = vmatmul.mubr.f32.vlgmr.msra.gmra.mxu0 %v73_v8 }
  0x79   :  { %480 = vmatmul.mubr.f32.vlgmr.msra.gmra.mxu1 %v75_v9  ;;  %731 = vmatprep.subr.mxu0 %v867_v11 }
  0x7a   :  { %739 = vmatprep.mubr.msk.f32.mxu0 %vm868_vm0, %v867_v11  ;;  %732 = vmatpush3.msra.mxu0 %v491_v10 }
  0x7b   :  { %733 = vmatprep.subr.mxu0 %v867_v11 }
  0x7c   :  { %734 = vmatpush3.msra.mxu0 %v490_v12 }
  0x7d   :  { %735 = vmatprep.subr.mxu0 %v867_v11 }
  0x7e   :  { %736 = vmatpush3.msra.mxu0 %v489_v13 }
  0x7f   :  { %737 = vmatprep.subr.mxu0 %v867_v11 }
  0x80   :  { %738 = vmatpush3.msra.mxu0 %v488_v14 }
  0x81   :  { %740 = vmatmul.mubr.msk.f32.vlgmr.msra.gmra.mxu0 %vm492_vm1, %v752_v15 }
 0x116   :  { %v618_v16 = vpop.f32.mrf.mxu0 }
 0x117   :  { %v653_v17 = vpop.f32.mrf.mxu1 }
 0x118   :  { %v619_v18 = vpop.f32.mrf.mxu0 }
 0x119   :  { %v654_v19 = vpop.f32.mrf.mxu1  ;;  %v620_v20 = vadd.f32 %v619_v18, %v618_v16 }
 0x11a   :  { %v655_v21 = vadd.f32 %v654_v19, %v653_v17 }
 0x11c   :  { %v342_v26 = vadd.f32 %v655_v21, %v620_v20 }
 0x138   :  { %v688_v22 = vpop.f32.mrf.mxu0 }
 0x139   :  { %v723_v23 = vpop.f32.mrf.mxu1 }
 0x13a   :  { %v689_v24 = vpop.f32.mrf.mxu0 }
 0x13b   :  { %v724_v25 = vpop.f32.mrf.mxu1  ;;  %v690_v27 = vadd.f32 %v689_v24, %v688_v22 }
 0x13c   :  { %v725_v29 = vadd.f32 %v724_v25, %v723_v23 }
 0x13d   :  { %v412_v28 = vadd.f32 %v690_v27, %v342_v26 }
 0x13f   :  { %v482_v30 = vadd.f32 %v725_v29, %v412_v28 }
 0x141   :  { %v562_v31 = vpop.f32.mrf.mxu0 }
 0x142   :  { %v566_v32 = vmul.f32 %v562_v31, %v482_v30 }
 0x143   :  { %v741_v33 = vpop.f32.mrf.mxu0 }
 0x144   :  { %567 = vst [vmem:[#allocation10] sm:$0xff] %v566_v32 }
 0x145   :  { %844 = shalt.err (!%p841_p10)
}
 0x146   :  { %577 = dma.vmem_to_hbm [thread:$0]  %s575_s3, 128, %s914_s4, [#allocation4]  }
 0x147   :  { %859 = dma.done.wait [#allocation4], 128  }
 0x148   :  { %860 = vsyncadd [#allocation4], 4294967168 }
 0x149   :  { %581 = vsyncpa [#allocation3], 1 }
 0x14a   :  { %582 = vsyncpa [#allocation6], 1 }
 0x14b   :  { %583 = vsyncpa [#allocation9], 1 }
 0x14c   :  { %584 = vsyncpa [#allocation4], 1 }

</bundles_post_ra>
